<compile_context>
chip_gen: v5e
topology: v5e:2x2
jax: 0.10.0
libtpu: 0.0.40
codegen_flags: <defaults>
</compile_context>

<pallas_src>
import functools

import jax
import jax.numpy as jnp
from jax.experimental import pallas as pl
from jax.experimental.pallas import tpu as pltpu


_LANE = 128          # lane width / minimum aligned tile edge
_MAX_TILE = 512      # 512^2 f32 tiles: ~85% HBM roofline, fits v7x 64 MiB VMEM comfortably
_VMEM_LIMIT = 32 * 1024 * 1024


def _round_up(x, m):
    return ((x + m - 1) // m) * m


def _pick_tile(n):
    return min(_MAX_TILE, _round_up(max(n, 1), _LANE))


# ----------------------------- in-kernel helpers ------------------------------

def _rbf_tile(params_ref, a, bT):
    """ARD RBF tile: k(a,b) = sigma_f * exp(-0.5 * sum_d ((a_d - b_d) / l_d)^2).

    a: [tm, D] (rows), bT: [D, tn] (pre-transposed columns -> lane-dense rows).
    params (SMEM): [sigma_f, sigma_n, 1/l_0^2, ..., 1/l_{D-1}^2].
    Direct-difference on the VPU: D is tiny so an MXU contraction would be >97% idle,
    and direct difference avoids the a^2+b^2-2ab cancellation.
    """
    d = a.shape[1]
    sq = None
    for dd in range(d):                                   # static, D is small
        diff = a[:, dd:dd + 1] - bT[dd:dd + 1, :]          # [tm, tn] broadcast (VPU)
        term = (diff * diff) * params_ref[2 + dd]          # * 1/l_d^2
        sq = term if sq is None else sq + term
    return params_ref[0] * jnp.exp(-0.5 * sq)              # EUP exp


# ----------------------------- RBF kernel matrix ------------------------------

def _rbf_matrix_body(params_ref, a_ref, bT_ref, out_ref, *, add_noise_diag):
    vals = _rbf_tile(params_ref, a_ref[...], bT_ref[...])
    out_ref[...] = vals

    if add_noise_diag:
        # Fused (K + sigma_n I): square tiles, so the diagonal only crosses i == j blocks;
        # off-diagonal tiles skip the compare/select entirely.
        i = pl.program_id(0)
        j = pl.program_id(1)

        @pl.when(i == j)
        def _():
            r = jax.lax.broadcasted_iota(jnp.int32, vals.shape, 0)
            c = jax.lax.broadcasted_iota(jnp.int32, vals.shape, 1)
            out_ref[...] = jnp.where(r == c, vals + params_ref[1], vals)


def rbf_matrix(params, a, bT, tile_r, tile_c, *, add_noise_diag):
    rows_p, d = a.shape
    cols_p = bT.shape[1]
    grid = (rows_p // tile_r, cols_p // tile_c)
    kernel = functools.partial(_rbf_matrix_body, add_noise_diag=add_noise_diag)
    return pl.pallas_call(
        kernel,
        grid_spec=pltpu.PrefetchScalarGridSpec(
            num_scalar_prefetch=1,                          # params -> SMEM
            grid=grid,
            in_specs=[
                pl.BlockSpec((tile_r, d), lambda i, j, p: (i, 0)),   # a rows
                pl.BlockSpec((d, tile_c), lambda i, j, p: (0, j)),   # b columns (transposed)
            ],
            out_specs=pl.BlockSpec((tile_r, tile_c), lambda i, j, p: (i, j)),
        ),
        out_shape=jax.ShapeDtypeStruct((rows_p, cols_p), jnp.float32),
        compiler_params=pltpu.CompilerParams(
            dimension_semantics=("parallel", "parallel"),
            vmem_limit_bytes=_VMEM_LIMIT,
        ),
    )(params, a, bT)


# ------------------------- fused predictive mean / cov ------------------------

def _predict_body(params_ref, xr_ref, xcT_ref, kxs_ref, w_ref, alpha_ref,
                  cov_ref, mean_ref, acc_cov, acc_mean):
    i = pl.program_id(0)
    j = pl.program_id(1)
    k = pl.program_id(2)          # contraction over train points (innermost)
    nk = pl.num_programs(2)

    @pl.when(k == 0)
    def _():
        acc_cov[...] = jnp.zeros_like(acc_cov)

    kxs = kxs_ref[...]            # [tm, tk] -- loaded once, shared by cov and mean matmuls
    acc_cov[...] += jnp.dot(kxs, w_ref[...], preferred_element_type=jnp.float32)

    # Mean matvec only needs one pass over the column axis; do it at j == 0.
    @pl.when(j == 0)
    def _():
        @pl.when(k == 0)
        def _():
            acc_mean[...] = jnp.zeros_like(acc_mean)

        acc_mean[...] += jnp.dot(kxs, alpha_ref[...], preferred_element_type=jnp.float32)

        @pl.when(k == nk - 1)
        def _():
            mean_ref[...] = acc_mean[...]       # lane-dense [tm, 128] tile; col 0 = mean

    @pl.when(k == nk - 1)
    def _():
        # K_** tile generated in-kernel (fused): no M^2 HBM round trip.
        kss = _rbf_tile(params_ref, xr_ref[...], xcT_ref[...])
        cov = kss - acc_cov[...]
        cov_ref[...] = cov

        # Observation noise from the Gaussian likelihood, only on diagonal tiles.
        @pl.when(i == j)
        def _():
            r = jax.lax.broadcasted_iota(jnp.int32, cov.shape, 0)
            c = jax.lax.broadcasted_iota(jnp.int32, cov.shape, 1)
            cov_ref[...] = jnp.where(r == c, cov + params_ref[1], cov)


def predict(params, x_rows, xT_cols, kxs, w, alpha, tile_m, tile_k):
    mp, d = x_rows.shape
    np_ = kxs.shape[1]
    grid = (mp // tile_m, mp // tile_m, np_ // tile_k)
    return pl.pallas_call(
        _predict_body,
        grid_spec=pltpu.PrefetchScalarGridSpec(
            num_scalar_prefetch=1,                                          # params -> SMEM
            grid=grid,
            in_specs=[
                pl.BlockSpec((tile_m, d), lambda i, j, k, p: (i, 0)),       # test rows (K_**)
                pl.BlockSpec((d, tile_m), lambda i, j, k, p: (0, j)),       # test cols^T (K_**)
                pl.BlockSpec((tile_m, tile_k), lambda i, j, k, p: (i, k)),  # K_*x
                pl.BlockSpec((tile_k, tile_m), lambda i, j, k, p: (k, j)),  # W = G^-1 K_x*
                pl.BlockSpec((tile_k, _LANE), lambda i, j, k, p: (k, 0)),   # alpha (col 0)
            ],
            out_specs=[
                pl.BlockSpec((tile_m, tile_m), lambda i, j, k, p: (i, j)),  # covariance
                pl.BlockSpec((tile_m, _LANE), lambda i, j, k, p: (i, 0)),   # mean slab
            ],
            scratch_shapes=[
                pltpu.VMEM((tile_m, tile_m), jnp.float32),   # cov accumulator
                pltpu.VMEM((tile_m, _LANE), jnp.float32),    # mean accumulator
            ],
        ),
        out_shape=(
            jax.ShapeDtypeStruct((mp, mp), jnp.float32),
            jax.ShapeDtypeStruct((mp, _LANE), jnp.float32),
        ),
        compiler_params=pltpu.CompilerParams(
            # j must stay "arbitrary": the mean output block (i, 0) is shared across j,
            # so splitting j across TensorCores would race on its writeback.
            dimension_semantics=("parallel", "arbitrary", "arbitrary"),
            vmem_limit_bytes=_VMEM_LIMIT,
        ),
    )(params, x_rows, xT_cols, kxs, w, alpha)


# ------------------------------ GPModel wrapper -------------------------------

class GPModelPallas:
    """JAX/Pallas equivalent of GPModel's forward (eval-mode exact GP prediction)."""

    def __init__(self, train_x, train_y, sigma_f=1.5, lengthscale=None, sigma_n=0.1):
        # TODO(synk): the torch __init__ runs a gpytorch Adam hyperparameter-training
        # loop; here hyperparameters are set deterministically instead of trained.
        self.train_x = jnp.asarray(train_x, jnp.float32)
        self.train_y = jnp.asarray(train_y, jnp.float32)
        d = self.train_x.shape[1]
        if lengthscale is None:
            lengthscale = jnp.linspace(0.8, 1.2, d)
        self.lengthscale = jnp.asarray(lengthscale, jnp.float32)     # ARD, shape [D]
        self.sigma_f = jnp.asarray([sigma_f], jnp.float32)           # outputscale
        self.sigma_n = jnp.asarray([sigma_n], jnp.float32)           # likelihood noise

    def forward(self, x):
        x = jnp.asarray(x, jnp.float32)
        n, d = self.train_x.shape
        m = x.shape[0]

        tile_n = _pick_tile(n)
        tile_m = _pick_tile(m)
        np_ = _round_up(n, tile_n)
        mp = _round_up(m, tile_m)

        # [sigma_f, sigma_n, 1/l_0^2, ..., 1/l_{D-1}^2] -> SMEM via scalar prefetch.
        params = jnp.concatenate(
            [self.sigma_f, self.sigma_n, 1.0 / (self.lengthscale ** 2)]
        ).astype(jnp.float32)

        # Pad points to tile multiples; padded rows/cols are sliced away (and padded train
        # contributions are zeroed via zero-padded alpha / W below).
        tx = jnp.zeros((np_, d), jnp.float32).at[:n].set(self.train_x)
        xx = jnp.zeros((mp, d), jnp.float32).at[:m].set(x)
        txT = tx.T            # [D, Np], tiny — gives lane-dense per-dimension rows
        xxT = xx.T            # [D, Mp]

        # Kernel matrices (Pallas). Noise diagonal fused into the train Gram.
        # K is computed by the same formula for (i,j) and (j,i), so the Gram is exactly
        # symmetric as required by the Cholesky.
        gram_p = rbf_matrix(params, tx, txT, tile_n, tile_n, add_noise_diag=True)   # [Np,Np]
        kxs_p = rbf_matrix(params, xx, txT, tile_m, tile_n, add_noise_diag=False)   # [Mp,Np]

        gram = gram_p[:n, :n]
        kxs = kxs_p[:m, :n]

        # TODO(synk): Cholesky factorization / triangular solve has no clean Pallas
        # equivalent; done in plain JAX (glue). Single solve for [alpha | W]; the one small
        # XLA transpose here keeps the in-kernel contraction in clean [M,N]@[N,M] MXU form.
        chol = jnp.linalg.cholesky(gram)
        rhs = jnp.concatenate([self.train_y[:, None], kxs.T], axis=1)     # [N, 1+M]
        sol = jax.scipy.linalg.cho_solve((chol, True), rhs)
        alpha = sol[:, 0]          # [N]
        w = sol[:, 1:]             # [N, M]

        # Zero-padded so padded train indices contribute nothing to the contraction.
        alpha_p = jnp.zeros((np_, _LANE), jnp.float32).at[:n, 0].set(alpha)
        w_p = jnp.zeros((np_, mp), jnp.float32).at[:n, :m].set(w)

        # Fused predictive mean / covariance (Pallas): K_** generated in-kernel,
        # mean matvec shares the K_*x tiles, noise added on diagonal tiles only.
        cov_p, mean_p = predict(params, xx, xxT, kxs_p, w_p, alpha_p, tile_m, tile_n)
        return mean_p[:m, 0], cov_p[:m, :m]    # MultivariateNormal(mean, cov) parameters


# ------------------------------- reference ------------------------------------

def _reference(x, train_x, train_y, sigma_f, lengthscale, sigma_n):
    def k(a, b):
        d2 = jnp.sum(((a[:, None, :] - b[None, :, :]) / lengthscale) ** 2, axis=-1)
        return sigma_f * jnp.exp(-0.5 * d2)

    n, m = train_x.shape[0], x.shape[0]
    gram = k(train_x, train_x) + sigma_n * jnp.eye(n)
    k_xs = k(x, train_x)
    k_ss = k(x, x)
    rhs = jnp.concatenate([train_y[:, None], k_xs.T], axis=1)
    sol = jnp.linalg.solve(gram, rhs)
    mean = k_xs @ sol[:, 0]
    cov = k_ss - k_xs @ sol[:, 1:] + sigma_n * jnp.eye(m)
    return mean, cov


# --------------------------------- main ----------------------------------------

if __name__ == "__main__":
    key = jax.random.PRNGKey(0)
    k1, k2, k3 = jax.random.split(key, 3)

    N, D, M = 16, 3, 8
    train_x = jax.random.normal(k1, (N, D), dtype=jnp.float32)
    train_y = jnp.sin(jnp.sum(train_x, axis=1)) + 0.05 * jax.random.normal(
        k2, (N,), dtype=jnp.float32)
    test_x = jax.random.normal(k3, (M, D), dtype=jnp.float32)

    model = GPModelPallas(train_x, train_y, sigma_f=1.5,
                          lengthscale=jnp.array([0.8, 1.2, 1.0], jnp.float32),
                          sigma_n=0.1)

    mean, cov = model.forward(test_x)
    mean, cov = jax.block_until_ready((mean, cov))

    ref_mean, ref_cov = _reference(test_x, train_x, train_y,
                                   1.5, jnp.array([0.8, 1.2, 1.0]), 0.1)
    assert mean.shape == (M,) and cov.shape == (M, M)
    assert jnp.allclose(mean, ref_mean, atol=1e-4, rtol=1e-4)
    assert jnp.allclose(cov, ref_cov, atol=1e-4, rtol=1e-4)

    print("KERNEL_OK")
</pallas_src>

<mosaic_0001>
module attributes {stable_mosaic.version = 11 : i64} {
  func.func @_rbf_matrix_body(%arg0: i32, %arg1: i32, %arg2: memref<5xf32, #tpu.memory_space<smem>>, %arg3: memref<128x3xf32, #tpu.memory_space<vmem>>, %arg4: memref<3x128xf32, #tpu.memory_space<vmem>>, %arg5: memref<128x128xf32, #tpu.memory_space<vmem>>) attributes {dimension_semantics = [#tpu.dimension_semantics<parallel>, #tpu.dimension_semantics<parallel>], iteration_bounds = array<i64: 1, 1>, scalar_prefetch = 1 : i64, scratch_operands = 0 : i64, tpu.core_type = #tpu.core_type<tc>, window_params = [{transform_indices = @transform_0, window_bounds = array<i64: 128, 3>}, {transform_indices = @transform_1, window_bounds = array<i64: 3, 128>}, {transform_indices = @transform_2, window_bounds = array<i64: 128, 128>}]} {
    %c0 = arith.constant 0 : index
    %c0_0 = arith.constant 0 : index
    %0 = vector.load %arg3[%c0, %c0_0] : memref<128x3xf32, #tpu.memory_space<vmem>>, vector<128x3xf32>
    %c0_1 = arith.constant 0 : index
    %c0_2 = arith.constant 0 : index
    %1 = vector.load %arg4[%c0_1, %c0_2] : memref<3x128xf32, #tpu.memory_space<vmem>>, vector<3x128xf32>
    %2 = vector.extract_strided_slice %0 {offsets = [0, 0], sizes = [128, 1], strides = [1, 1]} : vector<128x3xf32> to vector<128x1xf32>
    %3 = vector.extract_strided_slice %1 {offsets = [0, 0], sizes = [1, 128], strides = [1, 1]} : vector<3x128xf32> to vector<1x128xf32>
    %4 = vector.broadcast %2 : vector<128x1xf32> to vector<128x128xf32>
    %5 = vector.broadcast %3 : vector<1x128xf32> to vector<128x128xf32>
    %6 = arith.subf %4, %5 : vector<128x128xf32>
    %7 = arith.mulf %6, %6 : vector<128x128xf32>
    %c2 = arith.constant 2 : index
    %8 = memref.load %arg2[%c2] : memref<5xf32, #tpu.memory_space<smem>>
    %9 = vector.broadcast %8 : f32 to vector<128x128xf32>
    %10 = arith.mulf %7, %9 : vector<128x128xf32>
    %11 = vector.extract_strided_slice %0 {offsets = [0, 1], sizes = [128, 1], strides = [1, 1]} : vector<128x3xf32> to vector<128x1xf32>
    %12 = vector.extract_strided_slice %1 {offsets = [1, 0], sizes = [1, 128], strides = [1, 1]} : vector<3x128xf32> to vector<1x128xf32>
    %13 = vector.broadcast %11 : vector<128x1xf32> to vector<128x128xf32>
    %14 = vector.broadcast %12 : vector<1x128xf32> to vector<128x128xf32>
    %15 = arith.subf %13, %14 : vector<128x128xf32>
    %16 = arith.mulf %15, %15 : vector<128x128xf32>
    %c3 = arith.constant 3 : index
    %17 = memref.load %arg2[%c3] : memref<5xf32, #tpu.memory_space<smem>>
    %18 = vector.broadcast %17 : f32 to vector<128x128xf32>
    %19 = arith.mulf %16, %18 : vector<128x128xf32>
    %20 = arith.addf %10, %19 : vector<128x128xf32>
    %21 = vector.extract_strided_slice %0 {offsets = [0, 2], sizes = [128, 1], strides = [1, 1]} : vector<128x3xf32> to vector<128x1xf32>
    %22 = vector.extract_strided_slice %1 {offsets = [2, 0], sizes = [1, 128], strides = [1, 1]} : vector<3x128xf32> to vector<1x128xf32>
    %23 = vector.broadcast %21 : vector<128x1xf32> to vector<128x128xf32>
    %24 = vector.broadcast %22 : vector<1x128xf32> to vector<128x128xf32>
    %25 = arith.subf %23, %24 : vector<128x128xf32>
    %26 = arith.mulf %25, %25 : vector<128x128xf32>
    %c4 = arith.constant 4 : index
    %27 = memref.load %arg2[%c4] : memref<5xf32, #tpu.memory_space<smem>>
    %28 = vector.broadcast %27 : f32 to vector<128x128xf32>
    %29 = arith.mulf %26, %28 : vector<128x128xf32>
    %30 = arith.addf %20, %29 : vector<128x128xf32>
    %c0_3 = arith.constant 0 : index
    %31 = memref.load %arg2[%c0_3] : memref<5xf32, #tpu.memory_space<smem>>
    %cst = arith.constant -5.000000e-01 : f32
    %32 = vector.broadcast %cst : f32 to vector<128x128xf32>
    %33 = arith.mulf %32, %30 : vector<128x128xf32>
    %34 = math.exp %33 : vector<128x128xf32>
    %35 = vector.broadcast %31 : f32 to vector<128x128xf32>
    %36 = arith.mulf %35, %34 : vector<128x128xf32>
    %c0_4 = arith.constant 0 : index
    %c0_5 = arith.constant 0 : index
    %37 = vector.load %arg5[%c0_4, %c0_5] : memref<128x128xf32, #tpu.memory_space<vmem>>, vector<128x128xf32>
    tpu.vector_store %arg5[%c0_4, %c0_5], %36 {strides = array<i32>} : memref<128x128xf32, #tpu.memory_space<vmem>>, vector<128x128xf32>,
    %38 = arith.cmpi eq, %arg0, %arg1 : i32
    %39 = arith.extui %38 : i1 to i32
    %c0_i32 = arith.constant 0 : i32
    %40 = arith.cmpi ne, %39, %c0_i32 : i32
    scf.if %40 {
      %41 = tpu.iota {dimensions = array<i32: 0>} : vector<128x128xi32>
      %42 = tpu.iota {dimensions = array<i32: 1>} : vector<128x128xi32>
      %43 = arith.cmpi eq, %41, %42 : vector<128x128xi32>
      %c1 = arith.constant 1 : index
      %44 = memref.load %arg2[%c1] : memref<5xf32, #tpu.memory_space<smem>>
      %45 = vector.broadcast %44 : f32 to vector<128x128xf32>
      %46 = arith.addf %36, %45 : vector<128x128xf32>
      %47 = arith.select %43, %46, %36 : vector<128x128xi1>, vector<128x128xf32>
      %c0_6 = arith.constant 0 : index
      %c0_7 = arith.constant 0 : index
      %48 = vector.load %arg5[%c0_6, %c0_7] : memref<128x128xf32, #tpu.memory_space<vmem>>, vector<128x128xf32>
      tpu.vector_store %arg5[%c0_6, %c0_7], %47 {strides = array<i32>} : memref<128x128xf32, #tpu.memory_space<vmem>>, vector<128x128xf32>,
    } else {
    }
    return
  }
  func.func @transform_0(%arg0: i32, %arg1: i32, %arg2: memref<5xf32, #tpu.memory_space<smem>>) -> (i32, i32) {
    %c0_i32 = arith.constant 0 : i32
    %c0_i32_0 = arith.constant 0 : i32
    return %arg0, %c0_i32 : i32, i32
  }
  func.func @transform_1(%arg0: i32, %arg1: i32, %arg2: memref<5xf32, #tpu.memory_space<smem>>) -> (i32, i32) {
    %c0_i32 = arith.constant 0 : i32
    %c0_i32_0 = arith.constant 0 : i32
    return %c0_i32, %arg1 : i32, i32
  }
  func.func @transform_2(%arg0: i32, %arg1: i32, %arg2: memref<5xf32, #tpu.memory_space<smem>>) -> (i32, i32) {
    %c0_i32 = arith.constant 0 : i32
    return %arg0, %arg1 : i32, i32
  }
}

</mosaic_0001>

<bundles_post_ra>
// kernel: tpu_custom_call.1
= control target key start
LH: loop header
LB: loop body
LE: loop exit
PB: predicated region body
PF: predicated region fallthrough
CT: control target
= control target key end

     0   :  { %s712_s15 = smov [#allocation3]   ;;  %s1120_s0 = inlined_call_operand.vmem [shape: f32[5], index: 0, kind: input, shape index: {}]   ;;  %s1121_s1 = inlined_call_operand.vmem [shape: f32[128,3], index: 1, kind: input, shape index: {}]   ;;  %s1122_s2 = inlined_call_operand.vmem [shape: f32[3,128], index: 2, kind: input, shape index: {}]   ;;  %s1123_s3 = inlined_call_operand.hbm [shape: f32[128,128], index: 3, kind: output, shape index: {}]  }
   0x1   :  { %s9_s14 = sshll.u32 %s1120_s0, 4  ;;  %s10_s14 = int_to_ptr.vmem [resolvable:$true] %s9_s14 }
   0x2   :  { %12 = dma.vmem_to_smem %s10_s14, 16, %s712_s15, [#allocation2] }
   0x3   :  { %708 = dma.done.wait [#allocation2], 16 }
   0x4   :  { %709 = vsyncadd [#allocation2], 4294967280 }
   0x5   :  { %15 = sfence }
   0x6   :  { %v745_v0 = vld [vmem:[%s1121_s1 + $0x20] sm:$0xff]  ;;  %v23_v1 = vld [vmem:[%s1121_s1 + $0x10] sm:$0xff]  ;;  %v713_v3 = vmov 0  }
   0x7   :  { %v21_v2 = vld [vmem:[%s1121_s1] sm:$0xff]  ;;  %633 = vset.pattern.permute.xlu2 %v713_v3  ;;  %632 = vset.pattern.permute.xlu1 %v713_v3 }
   0x8   :  { %631 = vset.pattern.permute.xlu0 %v713_v3  ;;  %60 = vperm.xlu2 %633, %v745_v0  }
   0x9   :  { %50 = vperm.xlu1 %632, %v23_v1   ;;  %40 = vperm.xlu0 %631, %v21_v2  }
   0xa   :  { %16 = vsyncpa [#allocation5], 0  ;;  %v26_v4 = vld [vmem:[%s1121_s1 + $0x28] sm:$0xff]  ;;  %v24_v5 = vld [vmem:[%s1121_s1 + $0x18] sm:$0xff]  ;;  %v714_v17 = vmov 1   ;;  %v715_v18 = vmov 2  }
   0xb   :  { %v22_v6 = vld [vmem:[%s1121_s1 + $0x8] sm:$0xff]  ;;  %v29_v7 = vld [vmem:[%s1121_s1 + $0x40] sm:$0xff]  ;;  %v28_v8 = vld [vmem:[%s1121_s1 + $0x38] sm:$0xff]  ;;  %s620_s21 = sld [smem:[#allocation3 + $0x2]]  ;;  %s716_s24 = smov [#allocation4]  }
   0xc   :  { %v27_v9 = vld [vmem:[%s1121_s1 + $0x30] sm:$0xff]  ;;  %v32_v10 = vld [vmem:[%s1121_s1 + $0x58] sm:$0xff]  ;;  %v30_v12 = vld [vmem:[%s1121_s1 + $0x48] sm:$0xff]  ;;  %s621_s0 = sld [smem:[#allocation3 + $0x3]]  ;;  %s606_s25 = sshll.u32 %s716_s24, 4  ;;  %s607_s25 = int_to_ptr.vmem [resolvable:$true] %s606_s25 }
   0xd   :  { %v31_v11 = vld [vmem:[%s1121_s1 + $0x50] sm:$0xff]  ;;  %v34_v14 = vld [vmem:[%s1121_s1 + $0x68] sm:$0xff]  ;;  %v33_v15 = vld [vmem:[%s1121_s1 + $0x60] sm:$0xff]  ;;  %s910_s22 = sld [smem:[#allocation3]]  ;;  %s608_s28 = sshll.u32 %s1123_s3, 4  ;;  %s609_s28 = int_to_ptr.hbm [resolvable:$true] %s608_s28 }
   0xe   :  { %v35_v13 = vld [vmem:[%s1121_s1 + $0x70] sm:$0xff]  ;;  %v36_v16 = vld [vmem:[%s1121_s1 + $0x78] sm:$0xff]  ;;  %v810_v25 = vld [vmem:[%s1122_s2] sm:$0x7]  ;;  %s622_s2 = sld [smem:[#allocation3 + $0x4]]  ;;  %s717_s29 = smov 128  }
   0xf   :  { %v817_v29 = vperm.slane %v810_v25, 0  ;;  %v821_v31 = vperm.slane %v810_v25, 1  ;;  %s914_s23 = sld [smem:[#allocation3 + $0x1]]  ;;  %s718_s30 = smov 8  }
  0x10   :  { %65 = vperm.xlu2 %633, %v26_v4  }
  0x11   :  { %55 = vperm.xlu1 %632, %v24_v5   ;;  %45 = vperm.xlu0 %631, %v22_v6   ;;  %v826_v37 = vstv %s620_s21 }
  0x12   :  { %v828_v38 = vstv %s621_s0 }
  0x18   :  { %80 = vperm.xlu2 %633, %v29_v7  }
  0x19   :  { %75 = vperm.xlu1 %632, %v28_v8   ;;  %70 = vperm.xlu0 %631, %v27_v9  }
  0x20   :  { %95 = vperm.xlu2 %633, %v32_v10  }
  0x21   :  { %90 = vperm.xlu1 %632, %v31_v11   ;;  %85 = vperm.xlu0 %631, %v30_v12  }
  0x28   :  { %110 = vperm.xlu2 %633, %v35_v13  }
  0x29   :  { %105 = vperm.xlu1 %632, %v34_v14   ;;  %100 = vperm.xlu0 %631, %v33_v15  }
  0x30   :  { %635 = vset.pattern.permute.xlu2 %v714_v17 }
  0x31   :  { %634 = vset.pattern.permute.xlu1 %v714_v17  ;;  %115 = vperm.xlu0 %631, %v36_v16  }
  0x32   :  { %174 = vperm.xlu2 %635, %v22_v6   ;;  %170 = vperm.xlu1 %634, %v21_v2  }
  0x39   :  { %636 = vset.pattern.permute.xlu0 %v714_v17 }
  0x3a   :  { %186 = vperm.xlu2 %635, %v745_v0   ;;  %182 = vperm.xlu1 %634, %v24_v5  }
  0x3b   :  { %178 = vperm.xlu0 %636, %v23_v1  }
  0x42   :  { %194 = vperm.xlu2 %635, %v27_v9   ;;  %190 = vperm.xlu1 %634, %v26_v4  }
  0x43   :  { %198 = vperm.xlu0 %636, %v28_v8  }
  0x4a   :  { %206 = vperm.xlu2 %635, %v30_v12   ;;  %202 = vperm.xlu1 %634, %v29_v7  }
  0x4b   :  { %210 = vperm.xlu0 %636, %v31_v11  }
  0x52   :  { %218 = vperm.xlu2 %635, %v33_v15   ;;  %214 = vperm.xlu1 %634, %v32_v10  }
  0x53   :  { %222 = vperm.xlu0 %636, %v34_v14  }
  0x5a   :  { %230 = vperm.xlu2 %635, %v36_v16   ;;  %226 = vperm.xlu1 %634, %v35_v13  }
  0x5b   :  { %637 = vset.pattern.permute.xlu0 %v715_v18 }
  0x5c   :  { %301 = vperm.xlu0 %637, %v21_v2  }
  0x62   :  { %639 = vset.pattern.permute.xlu2 %v715_v18  ;;  %638 = vset.pattern.permute.xlu1 %v715_v18  ;;  %v794_v19 = vpop.permute.xlu2 %60 }
  0x63   :  { %309 = vperm.xlu2 %639, %v23_v1   ;;  %305 = vperm.xlu1 %638, %v22_v6  }
  0x64   :  { %321 = vperm.xlu0 %637, %v26_v4  }
  0x6a   :  { %v796_v20 = vpop.permute.xlu2 %65 }
  0x6b   :  { %317 = vperm.xlu2 %639, %v745_v0   ;;  %313 = vperm.xlu1 %638, %v24_v5  }
  0x6c   :  { %333 = vperm.xlu0 %637, %v29_v7  }
  0x72   :  { %v799_v21 = vpop.permute.xlu2 %80 }
  0x73   :  { %329 = vperm.xlu2 %639, %v28_v8   ;;  %325 = vperm.xlu1 %638, %v27_v9  }
  0x74   :  { %345 = vperm.xlu0 %637, %v32_v10  }
  0x7a   :  { %v801_v22 = vpop.permute.xlu2 %95 }
  0x7b   :  { %v803_v23 = vpop.permute.xlu1 %50  ;;  %341 = vperm.xlu2 %639, %v31_v11   ;;  %337 = vperm.xlu1 %638, %v30_v12   ;;  %v805_v24 = vpop.permute.xlu0 %40 }
  0x7c   :  { %357 = vperm.xlu0 %637, %v35_v13  }
  0x82   :  { %v812_v26 = vpop.permute.xlu2 %110 }
  0x83   :  { %v814_v27 = vpop.permute.xlu1 %55  ;;  %353 = vperm.xlu2 %639, %v34_v14   ;;  %349 = vperm.xlu1 %638, %v33_v15   ;;  %v46_v28 = vpop.permute.xlu0 %45 }
  0x84   :  { %v120_v30 = vsub.f32 %v46_v28, %v817_v29 }
  0x86   :  { %v136_v32 = vmul.f32 %v120_v30, %v120_v30 }
  0x88   :  { %v154_v39 = vmul.f32 %v826_v37, %v136_v32  ;;  %v121_v32 = vsub.f32 %v803_v23, %v817_v29 }
  0x8b   :  { %v823_v33 = vpop.permute.xlu1 %75  ;;  %361 = vperm.xlu1 %638, %v36_v16   ;;  %v71_v34 = vpop.permute.xlu0 %70 }
  0x8c   :  { %v175_v35 = vpop.permute.xlu2 %174  ;;  %v125_v46 = vsub.f32 %v71_v34, %v817_v29 }
  0x8d   :  { %v235_v36 = vsub.f32 %v175_v35, %v821_v31 }
  0x8e   :  { %v141_v50 = vmul.f32 %v125_v46, %v125_v46  ;;  %v137_v46 = vmul.f32 %v121_v32, %v121_v32 }
  0x8f   :  { %v251_v40 = vmul.f32 %v235_v36, %v235_v36  ;;  %v870_v36 = vperm.slane %v810_v25, 2 }
  0x90   :  { %v159_v53 = vmul.f32 %v826_v37, %v141_v50 }
  0x91   :  { %v269_v41 = vmul.f32 %v828_v38, %v251_v40 }
  0x93   :  { %v832_v42 = vadd.f32 %v269_v41, %v154_v39  ;;  %v834_v43 = vpop.permute.xlu1 %90  ;;  %v86_v44 = vpop.permute.xlu0 %85  ;;  %v123_v39 = vsub.f32 %v794_v19, %v817_v29  ;;  %v124_v41 = vsub.f32 %v796_v20, %v817_v29 }
  0x94   :  { %v187_v45 = vpop.permute.xlu2 %186  ;;  %v128_v54 = vsub.f32 %v86_v44, %v817_v29  ;;  %v127_v44 = vsub.f32 %v799_v21, %v817_v29 }
  0x95   :  { %v238_v25 = vsub.f32 %v187_v45, %v821_v31  ;;  %v133_v45 = vsub.f32 %v812_v26, %v817_v29  ;;  %v129_v26 = vsub.f32 %v834_v43, %v817_v29 }
  0x96   :  { %v144_v61 = vmul.f32 %v128_v54, %v128_v54  ;;  %v143_v20 = vmul.f32 %v127_v44, %v127_v44  ;;  %v155_v54 = vmul.f32 %v826_v37, %v137_v46 }
  0x98   :  { %v162_v2 = vmul.f32 %v826_v37, %v144_v61 }
  0x9b   :  { %v837_v47 = vpop.permute.xlu1 %105  ;;  %v101_v48 = vpop.permute.xlu0 %100 }
  0x9c   :  { %v195_v49 = vpop.permute.xlu2 %194  ;;  %v131_v3 = vsub.f32 %v101_v48, %v817_v29 }
  0x9d   :  { %v240_v51 = vsub.f32 %v195_v49, %v821_v31 }
  0x9e   :  { %v147_v8 = vmul.f32 %v131_v3, %v131_v3 }
  0x9f   :  { %v256_v52 = vmul.f32 %v240_v51, %v240_v51  ;;  %v139_v51 = vmul.f32 %v123_v39, %v123_v39 }
  0xa0   :  { %v165_v12 = vmul.f32 %v826_v37, %v147_v8 }
  0xa1   :  { %v274_v55 = vmul.f32 %v828_v38, %v256_v52  ;;  %v887_v52 = vstv %s622_s2 }
  0xa3   :  { %v843_v56 = vadd.f32 %v274_v55, %v159_v53  ;;  %v116_v57 = vpop.permute.xlu0 %115  ;;  %v140_v53 = vmul.f32 %v124_v41, %v124_v41  ;;  %v130_v55 = vsub.f32 %v801_v22, %v817_v29 }
  0xa4   :  { %v134_v58 = vsub.f32 %v116_v57, %v817_v29  ;;  %v207_v59 = vpop.permute.xlu2 %206  ;;  %v846_v60 = vpop.permute.xlu1 %170  ;;  %v119_v57 = vsub.f32 %v805_v24, %v817_v29  ;;  %v906_v24 = vmul.f32 %v826_v37, %v143_v20  ;;  %v947_v20 = vstv %s910_s22 }
  0xa5   :  { %v243_v62 = vsub.f32 %v207_v59, %v821_v31  ;;  %v903_v22 = vmul.f32 %v826_v37, %v140_v53  ;;  %v146_v3 = vmul.f32 %v130_v55, %v130_v55  ;;  %v953_v55 = vstv %s914_s23 }
  0xa6   :  { %v150_v63 = vmul.f32 %v134_v58, %v134_v58  ;;  %v254_v58 = vmul.f32 %v238_v25, %v238_v25 }
  0xa7   :  { %v259_v0 = vmul.f32 %v243_v62, %v243_v62  ;;  %v157_v62 = vmul.f32 %v826_v37, %v139_v51 }
  0xa8   :  { %v168_v1 = vmul.f32 %v826_v37, %v150_v63  ;;  %v122_v63 = vsub.f32 %v814_v27, %v817_v29  ;;  %v149_v27 = vmul.f32 %v133_v45, %v133_v45 }
  0xa9   :  { %v277_v4 = vmul.f32 %v828_v38, %v259_v0  ;;  %v126_v0 = vsub.f32 %v823_v33, %v817_v29 }
  0xaa   :  { %v932_v39 = vmul.f32 %v826_v37, %v149_v27 }
  0xab   :  { %v853_v5 = vadd.f32 %v277_v4, %v162_v2  ;;  %v135_v4 = vmul.f32 %v119_v57, %v119_v57 }
  0xac   :  { %v219_v6 = vpop.permute.xlu2 %218  ;;  %v855_v7 = vpop.permute.xlu1 %182 }
  0xad   :  { %v246_v9 = vsub.f32 %v219_v6, %v821_v31  ;;  %v179_v10 = vpop.permute.xlu0 %178  ;;  %v517_v6 = vlaneseq }
  0xae   :  { %v236_v28 = vsub.f32 %v179_v10, %v821_v31 }
  0xaf   :  { %v262_v11 = vmul.f32 %v246_v9, %v246_v9  ;;  %v272_v9 = vmul.f32 %v828_v38, %v254_v58  ;;  %v934_v41 = vshrl.u32 %v517_v6, 7 }
  0xb0   :  { %v252_v35 = vmul.f32 %v236_v28, %v236_v28  ;;  %v145_v28 = vmul.f32 %v129_v26, %v129_v26 }
  0xb1   :  { %v280_v13 = vmul.f32 %v828_v38, %v262_v11 }
  0xb2   :  { %v270_v50 = vmul.f32 %v828_v38, %v252_v35  ;;  %v928_v35 = vmul.f32 %v826_v37, %v146_v3 }
  0xb3   :  { %v860_v14 = vadd.f32 %v280_v13, %v165_v12  ;;  %v138_v12 = vmul.f32 %v122_v63, %v122_v63  ;;  %v142_v13 = vmul.f32 %v126_v0, %v126_v0 }
  0xb4   :  { %v231_v15 = vpop.permute.xlu2 %230  ;;  %v862_v16 = vpop.permute.xlu1 %190  ;;  %v286_v59 = vadd.f32 %v270_v50, %v155_v54  ;;  %v942_v50 = vmul.f32 %v826_v37, %v145_v28  ;;  %v520_v54 = vadd.s32 16, %v934_v41 }
  0xb5   :  { %v249_v17 = vsub.f32 %v231_v15, %v821_v31  ;;  %v199_v18 = vpop.permute.xlu0 %198  ;;  %v234_v15 = vsub.f32 %v846_v60, %v821_v31  ;;  %v288_v60 = vadd.f32 %v272_v9, %v157_v62  ;;  %v160_v25 = vmul.f32 %v826_v37, %v142_v13 }
  0xb6   :  { %v241_v10 = vsub.f32 %v199_v18, %v821_v31  ;;  %v153_v18 = vmul.f32 %v826_v37, %v135_v4  ;;  %v522_v4 = vadd.s32 32, %v934_v41 }
  0xb7   :  { %v265_v30 = vmul.f32 %v249_v17, %v249_v17  ;;  %v237_v17 = vsub.f32 %v855_v7, %v821_v31 }
  0xb8   :  { %v257_v7 = vmul.f32 %v241_v10, %v241_v10 }
  0xb9   :  { %v283_v34 = vmul.f32 %v828_v38, %v265_v30  ;;  %v132_v30 = vsub.f32 %v837_v47, %v817_v29  ;;  %v156_v29 = vmul.f32 %v826_v37, %v138_v12  ;;  %v250_v47 = vmul.f32 %v234_v15, %v234_v15 }
  0xba   :  { %v253_v46 = vmul.f32 %v237_v17, %v237_v17 }
  0xbb   :  { %v874_v40 = vadd.f32 %v283_v34, %v168_v1  ;;  %v268_v62 = vmul.f32 %v828_v38, %v250_v47 }
  0xbc   :  { %v880_v48 = vpop.permute.xlu1 %202  ;;  %v271_v63 = vmul.f32 %v828_v38, %v253_v46 }
  0xbd   :  { %v882_v23 = vpop.permute.xlu0 %210  ;;  %v310_v49 = vpop.permute.xlu2 %309  ;;  %v242_v3 = vsub.f32 %v880_v48, %v821_v31  ;;  %v284_v12 = vadd.f32 %v268_v62, %v153_v18 }
  0xbe   :  { %v367_v19 = vsub.f32 %v310_v49, %v870_v36  ;;  %v239_v49 = vsub.f32 %v862_v16, %v821_v31  ;;  %v275_v16 = vmul.f32 %v828_v38, %v257_v7  ;;  %v244_v45 = vsub.f32 %v882_v23, %v821_v31 }
  0xbf   :  { %v974_v17 = vadd.f32 %v271_v63, %v156_v29 }
  0xc0   :  { %v383_v21 = vmul.f32 %v367_v19, %v367_v19  ;;  %v148_v19 = vmul.f32 %v132_v30, %v132_v30  ;;  %v255_v0 = vmul.f32 %v239_v49, %v239_v49  ;;  %v291_v10 = vadd.f32 %v275_v16, %v160_v25 }
  0xc2   :  { %v401_v61 = vmul.f32 %v887_v52, %v383_v21  ;;  %v950_v21 = vand.u32 127, %v517_v6  ;;  %v966_v23 = vmul.f32 %v826_v37, %v148_v19  ;;  %v273_v48 = vmul.f32 %v828_v38, %v255_v0 }
  0xc3   :  { %v258_v37 = vmul.f32 %v242_v3, %v242_v3 }
  0xc4   :  { %v417_v1 = vadd.f32 %v401_v61, %v286_v59  ;;  %v912_v2 = vpop.permute.xlu1 %214  ;;  %vm538_vm0 = vcmp.eq.s32.totalorder %v520_v54, %v950_v21  ;;  %vm540_vm1 = vcmp.eq.s32.totalorder %v522_v4, %v950_v21  ;;  %v289_v25 = vadd.f32 %v273_v48, %v903_v22 }
  0xc5   :  { %v916_v33 = vpop.permute.xlu0 %222  ;;  %v318_v8 = vpop.permute.xlu2 %317  ;;  %vm536_vm3 = vcmp.eq.s32.totalorder %v934_v41, %v950_v21 }
  0xc6   :  { %v434_v11 = vmul.f32 -0.5, %v417_v1  ;;  %v369_v43 = vsub.f32 %v318_v8, %v870_v36 }
  0xc8   :  { %v452_v32 = vmul.f32 1.442695, %v434_v11  ;;  %v385_v34 = vmul.f32 %v369_v43, %v369_v43  ;;  %v260_v11 = vmul.f32 %v244_v45, %v244_v45 }
  0xca   :  { %640 = vpow2.f32 %v452_v32  ;;  %v403_v44 = vmul.f32 %v887_v52, %v385_v34  ;;  %v247_v32 = vsub.f32 %v916_v33, %v821_v31  ;;  %v980_v34 = vadd.s32 56, %v934_v41 }
  0xcb   :  { %v245_v33 = vsub.f32 %v912_v2, %v821_v31 }
  0xcc   :  { %v419_v51 = vadd.f32 %v403_v44, %v288_v60  ;;  %v944_v53 = vpop.permute.xlu1 %226  ;;  %v278_v44 = vmul.f32 %v828_v38, %v260_v11  ;;  %vm543_vm2 = vcmp.eq.s32.totalorder %v980_v34, %v950_v21 }
  0xcd   :  { %v330_v57 = vpop.permute.xlu2 %329 }
  0xce   :  { %v436_v58 = vmul.f32 -0.5, %v419_v51  ;;  %v372_v59 = vsub.f32 %v330_v57, %v870_v36  ;;  %v302_v61 = vpop.permute.xlu0 %301  ;;  %v276_v57 = vmul.f32 %v828_v38, %v258_v37  ;;  %v294_v0 = vadd.f32 %v278_v44, %v942_v50 }
  0xcf   :  { %v365_v26 = vsub.f32 %v302_v61, %v870_v36 }
  0xd0   :  { %v641_v1 = vpop.eup %640  ;;  %v456_v27 = vmul.f32 1.442695, %v436_v58  ;;  %v388_v6 = vmul.f32 %v372_v59, %v372_v59  ;;  %v263_v59 = vmul.f32 %v247_v32, %v247_v32 }
  0xd1   :  { %v483_v8 = vmul.f32 %v641_v1, %v947_v20  ;;  %v381_v9 = vmul.f32 %v365_v26, %v365_v26  ;;  %v261_v26 = vmul.f32 %v245_v33, %v245_v33 }
  0xd2   :  { %642 = vpow2.f32 %v456_v27  ;;  %v406_v43 = vmul.f32 %v887_v52, %v388_v6  ;;  %v292_v27 = vadd.f32 %v276_v57, %v906_v24 }
  0xd3   :  { %v556_v13 = vadd.f32 %v953_v55, %v483_v8  ;;  %v399_v15 = vmul.f32 %v887_v52, %v381_v9 }
  0xd4   :  { %v422_v28 = vadd.f32 %v406_v43, %v291_v10  ;;  %v1006_v10 = vadd.s32 80, %v934_v41 }
  0xd5   :  { %v572_v30 = vsel %vm538_vm0, %v556_v13, %v483_v8  ;;  %v415_v18 = vadd.f32 %v399_v15, %v284_v12  ;;  %v342_v60 = vpop.permute.xlu2 %341  ;;  %v306_v7 = vpop.permute.xlu1 %305  ;;  %v281_v8 = vmul.f32 %v828_v38, %v263_v59 }
  0xd6   :  { %588 = vst [vmem:[#allocation4 + $0x10] sm:$0xff] %v572_v30  ;;  %v439_v47 = vmul.f32 -0.5, %v422_v28  ;;  %v375_v29 = vsub.f32 %v342_v60, %v870_v36  ;;  %v366_v46 = vsub.f32 %v306_v7, %v870_v36  ;;  %v322_v49 = vpop.permute.xlu0 %321  ;;  %v1012_v28 = vadd.s32 8, %v934_v41 }
  0xd7   :  { %v432_v19 = vmul.f32 -0.5, %v415_v18  ;;  %v370_v51 = vsub.f32 %v322_v49, %v870_v36  ;;  %vm546_vm4 = vcmp.eq.s32.totalorder %v1006_v10, %v950_v21 }
  0xd8   :  { %v643_v54 = vpop.eup %642  ;;  %v462_v16 = vmul.f32 1.442695, %v439_v47  ;;  %v391_v45 = vmul.f32 %v375_v29, %v375_v29  ;;  %v382_v58 = vmul.f32 %v366_v46, %v366_v46  ;;  %v297_v29 = vadd.f32 %v281_v8, %v966_v23 }
  0xd9   :  { %v485_v61 = vmul.f32 %v643_v54, %v947_v20  ;;  %v448_v62 = vmul.f32 1.442695, %v432_v19  ;;  %v386_v63 = vmul.f32 %v370_v51, %v370_v51  ;;  %v248_v54 = vsub.f32 %v944_v53, %v821_v31 }
  0xda   :  { %644 = vpow2.f32 %v462_v16  ;;  %v409_v22 = vmul.f32 %v887_v52, %v391_v45  ;;  %v400_v2 = vmul.f32 %v887_v52, %v382_v58  ;;  %v523_v31 = vadd.s32 40, %v934_v41 }
  0xdb   :  { %v558_v1 = vadd.f32 %v953_v55, %v485_v61  ;;  %646 = vpow2.f32 %v448_v62  ;;  %v404_v3 = vmul.f32 %v887_v52, %v386_v63  ;;  %vm537_vm5 = vcmp.eq.s32.totalorder %v1012_v28, %v950_v21 }
  0xdc   :  { %v425_v50 = vadd.f32 %v409_v22, %v294_v0  ;;  %v416_v6 = vadd.f32 %v400_v2, %v832_v42  ;;  %v279_v42 = vmul.f32 %v828_v38, %v261_v26  ;;  %vm541_vm6 = vcmp.eq.s32.totalorder %v523_v31, %v950_v21 }
  0xdd   :  { %v574_v9 = vsel %vm540_vm1, %v558_v1, %v485_v61  ;;  %v420_v11 = vadd.f32 %v404_v3, %v289_v25  ;;  %v354_v43 = vpop.permute.xlu2 %353  ;;  %v314_v12 = vpop.permute.xlu1 %313  ;;  %v264_v3 = vmul.f32 %v248_v54, %v248_v54  ;;  %v526_v28 = vadd.s32 64, %v934_v41 }
  0xde   :  { %590 = vst [vmem:[#allocation4 + $0x20] sm:$0xff] %v574_v9  ;;  %v442_v48 = vmul.f32 -0.5, %v425_v50  ;;  %v433_v24 = vmul.f32 -0.5, %v416_v6  ;;  %v378_v13 = vsub.f32 %v354_v43, %v870_v36  ;;  %v368_v15 = vsub.f32 %v314_v12, %v870_v36  ;;  %v334_v37 = vpop.permute.xlu0 %333 }
  0xdf   :  { %v437_v4 = vmul.f32 -0.5, %v420_v11  ;;  %v373_v30 = vsub.f32 %v334_v37, %v870_v36  ;;  %v295_v34 = vadd.f32 %v279_v42, %v928_v35  ;;  %v282_v42 = vmul.f32 %v828_v38, %v264_v3 }
  0xe0   :  { %v645_v32 = vpop.eup %644  ;;  %v468_v18 = vmul.f32 1.442695, %v442_v48  ;;  %v450_v60 = vmul.f32 1.442695, %v433_v24  ;;  %v394_v7 = vmul.f32 %v378_v13, %v378_v13  ;;  %v384_v44 = vmul.f32 %v368_v15, %v368_v15 }
  0xe1   :  { %v647_v47 = vpop.eup %646  ;;  %v488_v46 = vmul.f32 %v645_v32, %v947_v20  ;;  %v458_v49 = vmul.f32 1.442695, %v437_v4  ;;  %v389_v25 = vmul.f32 %v373_v30, %v373_v30  ;;  %v531_v48 = vadd.s32 104, %v934_v41 }
  0xe2   :  { %v481_v33 = vmul.f32 %v647_v47, %v947_v20  ;;  %648 = vpow2.f32 %v468_v18  ;;  %v412_v19 = vmul.f32 %v887_v52, %v394_v7  ;;  %v402_v51 = vmul.f32 %v887_v52, %v384_v44 }
  0xe3   :  { %v561_v57 = vadd.f32 %v953_v55, %v488_v46  ;;  %650 = vpow2.f32 %v450_v60  ;;  %v407_v16 = vmul.f32 %v887_v52, %v389_v25  ;;  %v521_v60 = vadd.s32 24, %v934_v41 }
  0xe4   :  { %v554_v23 = vadd.f32 %v953_v55, %v481_v33  ;;  %652 = vpow2.f32 %v458_v49  ;;  %v428_v45 = vadd.f32 %v412_v19, %v297_v29  ;;  %v418_v58 = vadd.f32 %v402_v51, %v974_v17 }
  0xe5   :  { %v577_v59 = vsel %vm543_vm2, %v561_v57, %v488_v46  ;;  %v423_v53 = vadd.f32 %v407_v16, %v292_v27  ;;  %v326_v61 = vpop.permute.xlu1 %325  ;;  %vm549_vm7 = vcmp.eq.s32.totalorder %v531_v48, %v950_v21  ;;  %v298_v57 = vadd.f32 %v282_v42, %v932_v39 }
  0xe6   :  { %593 = vst [vmem:[#allocation4 + $0x38] sm:$0xff] %v577_v59  ;;  %v570_v62 = vsel %vm536_vm3, %v554_v23, %v481_v33  ;;  %v445_v63 = vmul.f32 -0.5, %v428_v45  ;;  %v435_v0 = vmul.f32 -0.5, %v418_v58  ;;  %v371_v17 = vsub.f32 %v326_v61, %v870_v36  ;;  %v346_v22 = vpop.permute.xlu0 %345 }
  0xe7   :  { %586 = vst [vmem:[#allocation4] sm:$0xff] %v570_v62  ;;  %v440_v2 = vmul.f32 -0.5, %v423_v53  ;;  %v376_v26 = vsub.f32 %v346_v22, %v870_v36  ;;  %vm539_vm9 = vcmp.eq.s32.totalorder %v521_v60, %v950_v21  ;;  %vm544_vm10 = vcmp.eq.s32.totalorder %v526_v28, %v950_v21 }
  0xe8   :  { %v649_v1 = vpop.eup %648  ;;  %v474_v27 = vmul.f32 1.442695, %v445_v63  ;;  %v454_v50 = vmul.f32 1.442695, %v435_v0  ;;  %v387_v6 = vmul.f32 %v371_v17, %v371_v17  ;;  %v532_v60 = vadd.s32 112, %v934_v41 }
  0xe9   :  { %v651_v8 = vpop.eup %650  ;;  %v491_v9 = vmul.f32 %v649_v1, %v947_v20  ;;  %v464_v11 = vmul.f32 1.442695, %v440_v2  ;;  %v392_v43 = vmul.f32 %v376_v26, %v376_v26  ;;  %v524_v26 = vadd.s32 48, %v934_v41 }
  0xea   :  { %v653_v35 = vpop.eup %652  ;;  %v482_v12 = vmul.f32 %v651_v8, %v947_v20  ;;  %654 = vpow2.f32 %v474_v27  ;;  %v405_v24 = vmul.f32 %v887_v52, %v387_v6  ;;  %vm550_vm14 = vcmp.eq.s32.totalorder %v532_v60, %v950_v21 }
  0xeb   :  { %v564_v13 = vadd.f32 %v953_v55, %v491_v9  ;;  %v486_v15 = vmul.f32 %v653_v35, %v947_v20  ;;  %656 = vpow2.f32 %v454_v50  ;;  %v410_v37 = vmul.f32 %v887_v52, %v392_v43 }
  0xec   :  { %v555_v4 = vadd.f32 %v953_v55, %v482_v12  ;;  %658 = vpow2.f32 %v464_v11  ;;  %v421_v30 = vadd.f32 %v405_v24, %v843_v56  ;;  %v1061_v56 = vadd.s32 120, %v934_v41 }
  0xed   :  { %v580_v32 = vsel %vm546_vm4, %v564_v13, %v491_v9  ;;  %v559_v18 = vadd.f32 %v953_v55, %v486_v15  ;;  %v426_v7 = vadd.f32 %v410_v37, %v295_v34  ;;  %v338_v44 = vpop.permute.xlu1 %337  ;;  %vm542_vm11 = vcmp.eq.s32.totalorder %v524_v26, %v950_v21 }
  0xee   :  { %596 = vst [vmem:[#allocation4 + $0x50] sm:$0xff] %v580_v32  ;;  %v571_v38 = vsel %vm537_vm5, %v555_v4, %v482_v12  ;;  %v438_v47 = vmul.f32 -0.5, %v421_v30  ;;  %v374_v29 = vsub.f32 %v338_v44, %v870_v36  ;;  %v358_v46 = vpop.permute.xlu0 %357  ;;  %vm551_vm8 = vcmp.eq.s32.totalorder %v1061_v56, %v950_v21 }
  0xef   :  { %587 = vst [vmem:[#allocation4 + $0x8] sm:$0xff] %v571_v38  ;;  %v575_v10 = vsel %vm541_vm6, %v559_v18, %v486_v15  ;;  %v443_v49 = vmul.f32 -0.5, %v426_v7  ;;  %v379_v25 = vsub.f32 %v358_v46, %v870_v36  ;;  %v527_v30 = vadd.s32 72, %v934_v41 }
  0xf0   :  { %v655_v33 = vpop.eup %654  ;;  %591 = vst [vmem:[#allocation4 + $0x28] sm:$0xff] %v575_v10  ;;  %v460_v19 = vmul.f32 1.442695, %v438_v47  ;;  %v390_v51 = vmul.f32 %v374_v29, %v374_v29  ;;  %v530_v28 = vadd.s32 96, %v934_v41 }
  0xf1   :  { %v657_v54 = vpop.eup %656  ;;  %v494_v16 = vmul.f32 %v655_v33, %v947_v20  ;;  %v470_v23 = vmul.f32 1.442695, %v443_v49  ;;  %v395_v45 = vmul.f32 %v379_v25, %v379_v25  ;;  %vm545_vm13 = vcmp.eq.s32.totalorder %v527_v30, %v950_v21 }
  0xf2   :  { %v659_v58 = vpop.eup %658  ;;  %v484_v59 = vmul.f32 %v657_v54, %v947_v20  ;;  %660 = vpow2.f32 %v460_v19  ;;  %v408_v31 = vmul.f32 %v887_v52, %v390_v51  ;;  %vm548_vm15 = vcmp.eq.s32.totalorder %v530_v28, %v950_v21 }
  0xf3   :  { %v567_v53 = vadd.f32 %v953_v55, %v494_v16  ;;  %v489_v61 = vmul.f32 %v659_v58, %v947_v20  ;;  %662 = vpow2.f32 %v470_v23  ;;  %v413_v62 = vmul.f32 %v887_v52, %v395_v45 }
  0xf4   :  { %v557_v39 = vadd.f32 %v953_v55, %v484_v59  ;;  %v424_v63 = vadd.f32 %v408_v31, %v853_v5  ;;  %v529_v5 = vadd.s32 88, %v934_v41 }
  0xf5   :  { %v583_v0 = vsel %vm549_vm7, %v567_v53, %v494_v16  ;;  %v562_v17 = vadd.f32 %v953_v55, %v489_v61  ;;  %v429_v22 = vadd.f32 %v413_v62, %v298_v57  ;;  %v350_v34 = vpop.permute.xlu1 %349 }
  0xf6   :  { %599 = vst [vmem:[#allocation4 + $0x68] sm:$0xff] %v583_v0  ;;  %v573_v2 = vsel %vm539_vm9, %v557_v39, %v484_v59  ;;  %v441_v1 = vmul.f32 -0.5, %v424_v63  ;;  %v377_v3 = vsub.f32 %v350_v34, %v870_v36  ;;  %vm547_vm12 = vcmp.eq.s32.totalorder %v529_v5, %v950_v21 }
  0xf7   :  { %589 = vst [vmem:[#allocation4 + $0x18] sm:$0xff] %v573_v2  ;;  %v578_v27 = vsel %vm544_vm10, %v562_v17, %v489_v61  ;;  %v446_v50 = vmul.f32 -0.5, %v429_v22 }
  0xf8   :  { %v661_v6 = vpop.eup %660  ;;  %594 = vst [vmem:[#allocation4 + $0x40] sm:$0xff] %v578_v27  ;;  %v466_v8 = vmul.f32 1.442695, %v441_v1  ;;  %v393_v9 = vmul.f32 %v377_v3, %v377_v3 }
  0xf9   :  { %v663_v11 = vpop.eup %662  ;;  %v487_v43 = vmul.f32 %v661_v6, %v947_v20  ;;  %v476_v35 = vmul.f32 1.442695, %v446_v50 }
  0xfa   :  { %v492_v12 = vmul.f32 %v663_v11, %v947_v20  ;;  %664 = vpow2.f32 %v466_v8  ;;  %v411_v48 = vmul.f32 %v887_v52, %v393_v9 }
  0xfb   :  { %v560_v24 = vadd.f32 %v953_v55, %v487_v43  ;;  %666 = vpow2.f32 %v476_v35 }
  0xfc   :  { %v565_v13 = vadd.f32 %v953_v55, %v492_v12  ;;  %v427_v15 = vadd.f32 %v411_v48, %v860_v14 }
  0xfd   :  { %v576_v37 = vsel %vm542_vm11, %v560_v24, %v487_v43  ;;  %v362_v42 = vpop.permute.xlu1 %361 }
  0xfe   :  { %592 = vst [vmem:[#allocation4 + $0x30] sm:$0xff] %v576_v37  ;;  %v581_v4 = vsel %vm547_vm12, %v565_v13, %v492_v12  ;;  %v444_v32 = vmul.f32 -0.5, %v427_v15  ;;  %v380_v18 = vsub.f32 %v362_v42, %v870_v36 }
  0xff   :  { %597 = vst [vmem:[#allocation4 + $0x58] sm:$0xff] %v581_v4 }
 0x100   :  { %v665_v7 = vpop.eup %664  ;;  %v472_v44 = vmul.f32 1.442695, %v444_v32  ;;  %v396_v38 = vmul.f32 %v380_v18, %v380_v18 }
 0x101   :  { %v667_v47 = vpop.eup %666  ;;  %v490_v29 = vmul.f32 %v665_v7, %v947_v20 }
 0x102   :  { %v495_v14 = vmul.f32 %v667_v47, %v947_v20  ;;  %668 = vpow2.f32 %v472_v44  ;;  %v414_v46 = vmul.f32 %v887_v52, %v396_v38 }
 0x103   :  { %v563_v10 = vadd.f32 %v953_v55, %v490_v29 }
 0x104   :  { %v568_v36 = vadd.f32 %v953_v55, %v495_v14  ;;  %v430_v49 = vadd.f32 %v414_v46, %v874_v40 }
 0x105   :  { %v579_v25 = vsel %vm545_vm13, %v563_v10, %v490_v29 }
 0x106   :  { %595 = vst [vmem:[#allocation4 + $0x48] sm:$0xff] %v579_v25  ;;  %v584_v33 = vsel %vm550_vm14, %v568_v36, %v495_v14  ;;  %v447_v19 = vmul.f32 -0.5, %v430_v49 }
 0x107   :  { %600 = vst [vmem:[#allocation4 + $0x70] sm:$0xff] %v584_v33 }
 0x108   :  { %v669_v51 = vpop.eup %668  ;;  %v478_v54 = vmul.f32 1.442695, %v447_v19 }
 0x109   :  { %v493_v57 = vmul.f32 %v669_v51, %v947_v20 }
 0x10a   :  { %670 = vpow2.f32 %v478_v54 }
 0x10b   :  { %v566_v52 = vadd.f32 %v953_v55, %v493_v57 }
 0x10d   :  { %v582_v16 = vsel %vm548_vm15, %v566_v52, %v493_v57 }
 0x10e   :  { %598 = vst [vmem:[#allocation4 + $0x60] sm:$0xff] %v582_v16 }
 0x110   :  { %v671_v23 = vpop.eup %670 }
 0x111   :  { %v496_v40 = vmul.f32 %v671_v23, %v947_v20 }
 0x113   :  { %v569_v41 = vadd.f32 %v953_v55, %v496_v40 }
 0x115   :  { %v585_v45 = vsel %vm551_vm8, %v569_v41, %v496_v40 }
 0x116   :  { %601 = vst [vmem:[#allocation4 + $0x78] sm:$0xff] %v585_v45 }
 0x117   :  { %614 = dma.vmem_to_hbm [thread:$0]  %s607_s25, 2048, %s609_s28, [#allocation5], %s717_s29, %s717_s29, %s718_s30  }
 0x118   :  { %710 = dma.done.wait [#allocation5], 2048  }
 0x119   :  { %711 = vsyncadd [#allocation5], 4294965248 }
 0x11a   :  { %619 = vsyncpa [#allocation5], 1 }

</bundles_post_ra>
